<compile_context>
chip_gen: v7x
topology: tpu7x:2x2x1
jax: 0.10.0
libtpu: 0.0.40
codegen_flags: <defaults>
</compile_context>

<pallas_src>
import functools
import math

import jax
import jax.numpy as jnp
from jax.experimental import pallas as pl
from jax.experimental.pallas import tpu as pltpu


# ----------------------------- Pallas kernel ------------------------------ #

def _spatial_attention_kernel(x_ref, o_ref, *, inv_sqrt_d):
    """One tile: x_ref (ts, N, F) -> o_ref (ts, N, N) = softmax(x x^T / sqrt(F))."""
    x = x_ref[...].astype(jnp.float32)                               # (ts, N, F)
    # Batched (over the row tile) x @ x^T, f32 accumulation on the MXU.
    s = jnp.einsum("snf,smf->snm", x, x,
                   preferred_element_type=jnp.float32) * inv_sqrt_d  # (ts, N, N)
    # Numerically stable softmax over the last axis.
    m = jnp.max(s, axis=-1, keepdims=True)
    e = jnp.exp(s - m)
    denom = jnp.sum(e, axis=-1, keepdims=True)
    o_ref[...] = (e * pl.reciprocal(denom)).astype(o_ref.dtype)


def _choose_rows_tile(n_rows, max_rows_tile):
    """Multiple-of-8 tile; keep >=2 grid steps when possible (v7x dual TC)."""
    half = pl.cdiv(n_rows, 2)
    tile = min(max_rows_tile, pl.cdiv(half, 8) * 8)
    return max(8, tile)


def spatial_attention_pallas(x, *, max_rows_tile=512, interpret=False):
    """x: (B, N, T, F_in) -> (B, T, N, N), matching Spatial_Attention_layer."""
    B, N, T, F = x.shape
    rows = B * T
    # Layout plumbing in the wrapper (matches the PyTorch permute+reshape).
    xr = jnp.transpose(x, (0, 2, 1, 3)).reshape(rows, N, F)

    tile = _choose_rows_tile(rows, max_rows_tile)
    grid_len = pl.cdiv(rows, tile)
    rows_pad = grid_len * tile
    if rows_pad != rows:
        # Zero rows -> score 0 -> uniform softmax (finite); sliced off below.
        xr = jnp.pad(xr, ((0, rows_pad - rows), (0, 0), (0, 0)))

    kernel = functools.partial(_spatial_attention_kernel,
                               inv_sqrt_d=1.0 / math.sqrt(F))
    cost = pl.CostEstimate(
        flops=2 * rows_pad * N * N * F + 4 * rows_pad * N * N,
        transcendentals=rows_pad * N * N,
        bytes_accessed=(rows_pad * N * F + rows_pad * N * N) * x.dtype.itemsize,
    )

    out = pl.pallas_call(
        kernel,
        out_shape=jax.ShapeDtypeStruct((rows_pad, N, N), x.dtype),
        grid_spec=pltpu.PrefetchScalarGridSpec(
            num_scalar_prefetch=0,
            grid=(grid_len,),
            in_specs=[pl.BlockSpec((tile, N, F), lambda i: (i, 0, 0))],
            out_specs=pl.BlockSpec((tile, N, N), lambda i: (i, 0, 0)),
        ),
        compiler_params=pltpu.CompilerParams(
            dimension_semantics=("parallel",),
        ),
        cost_estimate=cost,
        interpret=interpret,
    )(xr)

    out = out[:rows]
    return out.reshape(B, T, N, N)


# ------------------------------ module glue ------------------------------- #

class SpatialAttentionPallas:
    """JAX/Pallas port of DTIGNN.Spatial_Attention_layer (no parameters)."""

    def __init__(self, dropout=0.0):
        # Dropout with the default p=0.0 (or eval mode) is an identity.
        self.dropout = dropout

    def __call__(self, x):
        return spatial_attention_pallas(x)


# --------------------------------- main ----------------------------------- #

if __name__ == "__main__":
    key = jax.random.PRNGKey(0)
    batch, N, T, F_in = 2, 4, 16, 32
    x = jax.random.normal(key, (batch, N, T, F_in), jnp.float32)

    attn = SpatialAttentionPallas(dropout=0.0)
    out = jax.block_until_ready(attn(x))
    assert out.shape == (batch, T, N, N)

    # Pure-JAX reference.
    xr = jnp.transpose(x, (0, 2, 1, 3)).reshape(batch * T, N, F_in)
    score = jnp.einsum("snf,smf->snm", xr, xr) / math.sqrt(F_in)
    ref = jax.nn.softmax(score, axis=-1).reshape(batch, T, N, N)

    err = jnp.max(jnp.abs(out - ref))
    assert err < 1e-4, f"max abs err {err}"
    # Each attention row must be a probability distribution.
    assert jnp.max(jnp.abs(jnp.sum(out, axis=-1) - 1.0)) < 1e-5

    print("KERNEL_OK")
</pallas_src>

<mosaic_0001>
module attributes {stable_mosaic.version = 11 : i64} {
  func.func @_spatial_attention_kernel(%arg0: i32, %arg1: memref<16x4x32xf32, #tpu.memory_space<vmem>>, %arg2: memref<16x4x4xf32, #tpu.memory_space<vmem>>) attributes {dimension_semantics = [#tpu.dimension_semantics<parallel>], iteration_bounds = array<i64: 2>, scalar_prefetch = 0 : i64, scratch_operands = 0 : i64, tpu.core_type = #tpu.core_type<tc>, window_params = [{transform_indices = @transform_0, window_bounds = array<i64: 16, 4, 32>}, {transform_indices = @transform_1, window_bounds = array<i64: 16, 4, 4>}]} {
    %c0 = arith.constant 0 : index
    %c0_0 = arith.constant 0 : index
    %c0_1 = arith.constant 0 : index
    %0 = vector.load %arg1[%c0, %c0_0, %c0_1] : memref<16x4x32xf32, #tpu.memory_space<vmem>>, vector<16x4x32xf32>
    "tpu.trace_start"() <{level = 10 : i32, message = "snf,smf->snm"}> : () -> ()
    %cst = arith.constant dense<0.000000e+00> : vector<16x4x4xf32>
    %1 = tpu.matmul %0, %0, %cst {dimension_numbers = #tpu.dot_dimension_numbers<[2], [2], [1], [1], [0, 0, 0, 1, 1, 1], [0], [0]>} : vector<16x4x32xf32>, vector<16x4x32xf32>, vector<16x4x4xf32> -> vector<16x4x4xf32>
    "tpu.trace_stop"() : () -> ()
    %cst_2 = arith.constant 0.176776692 : f32
    %2 = vector.broadcast %cst_2 : f32 to vector<16x4x4xf32>
    %3 = arith.mulf %1, %2 : vector<16x4x4xf32>
    %cst_3 = arith.constant dense<0xFF800000> : vector<16x4xf32>
    %4 = vector.multi_reduction <maximumf>, %3, %cst_3 [2] : vector<16x4x4xf32> to vector<16x4xf32>
    %5 = vector.shape_cast %4 : vector<16x4xf32> to vector<16x4x1xf32>
    %6 = vector.broadcast %5 : vector<16x4x1xf32> to vector<16x4x4xf32>
    %7 = arith.subf %3, %6 : vector<16x4x4xf32>
    %8 = math.exp %7 : vector<16x4x4xf32>
    %cst_4 = arith.constant dense<0.000000e+00> : vector<16x4xf32>
    %9 = vector.multi_reduction <add>, %8, %cst_4 [2] : vector<16x4x4xf32> to vector<16x4xf32>
    %10 = vector.shape_cast %9 : vector<16x4xf32> to vector<16x4x1xf32>
    %11 = tpu.reciprocal %10 : vector<16x4x1xf32> -> vector<16x4x1xf32>
    %12 = vector.broadcast %11 : vector<16x4x1xf32> to vector<16x4x4xf32>
    %13 = arith.mulf %8, %12 : vector<16x4x4xf32>
    %c0_5 = arith.constant 0 : index
    %c0_6 = arith.constant 0 : index
    %c0_7 = arith.constant 0 : index
    %14 = vector.load %arg2[%c0_5, %c0_6, %c0_7] : memref<16x4x4xf32, #tpu.memory_space<vmem>>, vector<16x4x4xf32>
    tpu.vector_store %arg2[%c0_5, %c0_6, %c0_7], %13 {strides = array<i32>} : memref<16x4x4xf32, #tpu.memory_space<vmem>>, vector<16x4x4xf32>,
    return
  }
  func.func @transform_0(%arg0: i32) -> (i32, i32, i32) {
    %c0_i32 = arith.constant 0 : i32
    %c0_i32_0 = arith.constant 0 : i32
    %c0_i32_1 = arith.constant 0 : i32
    return %arg0, %c0_i32, %c0_i32_0 : i32, i32, i32
  }
  func.func @transform_1(%arg0: i32) -> (i32, i32, i32) {
    %c0_i32 = arith.constant 0 : i32
    %c0_i32_0 = arith.constant 0 : i32
    %c0_i32_1 = arith.constant 0 : i32
    return %arg0, %c0_i32, %c0_i32_0 : i32, i32, i32
  }
}

</mosaic_0001>

<bundles_post_ra>
// kernel: tpu_custom_call.1
= control target key start
LH: loop header
LB: loop body
LE: loop exit
PB: predicated region body
PF: predicated region fallthrough
CT: control target
= control target key end

     0   :  { %6 = vsyncpa [#allocation3], 0  ;;  %s2345_s0 = inlined_call_operand.hbm [shape: f32[32,4,32], index: 0, kind: input, shape index: {}]   ;;  %s2346_s1 = inlined_call_operand.vmem [shape: f32[32,4,4], index: 1, kind: output, shape index: {}]  }
   0x1   :  { %8 = vsyncpa [#allocation3 + $0x1], 0  ;;  %s1946_s6 = smov 0   ;;  %s1948_s7 = smov 0  }
   0x2   :  { %s1950_s8 = smov 0   ;;  %s1952_s9 = smov 0  }
   0x3 LB: > { %s1600_s10 = sadd.s32 4294967295, %s1929_s9   ;;  %s1966_s11 = sadd.s32 1, %s1929_s9   ;;  %s1929_s9 = sphi %s1952_s9, %s2353_s9   ;;  %s1925_s8 = sphi %s1950_s8, %s2352_s8   ;;  %s1921_s7 = sphi %s1948_s7, %s2351_s7   ;;  %s1917_s6 = sphi %s1946_s6, %s2350_s6  }
   0x4   : > { %s18_s12 = ssub.s32 %s1929_s9, %s1966_s11  ;;  %s21_s13 = sadd.s32 1, %s1925_s8 }
   0x5   : > { %p19_p0 = scmp.eq.s32.totalorder %s18_s12, 0  ;;  %p28_p1 = scmp.ne.s32.totalorder %s1925_s8, %s1921_s7 }
   0x6   : > { %p29_p2 = scmp.eq.s32.totalorder %s1929_s9, 0  ;;  %p34_p3 = scmp.ne.s32.totalorder %s1921_s7, %s1917_s6 }
   0x7   : > { %s1976_s14 = scalar_select %p19_p0, %s1925_s8, %s21_s13  }
   0x8   : > { %p30_p4 = por %p29_p2, %p28_p1  ;;  %p35_p5 = scmp.eq.s32.totalorder %s1600_s10, 0 }
   0x9   : > { %p1764_p6 = scmp.lt.s32.totalorder %s1929_s9, 2  ;;  %s84_s16 = sand.u32 1, %s1925_s8  }
   0xa   : > { %p1981_p7 = por %p35_p5, %p34_p3  ;;  %s1604_s17 = sshll.u32 %s84_s16, 6 }
   0xb   : > { %s1645_s18 = sshll.u32 %s1929_s9, 10  ;;  %s88_s22 = scalar_lea.vmem [#allocation2], %s1604_s17 }
   0xc   : > { %s1990_s21 = scalar_lea.hbm %s2345_s0, %s1645_s18  ;;  %s95_s23 = sshll.u32 %s88_s22, 4  ;;  %s1992_s23 = int_to_ptr.vmem [resolvable:$true] %s95_s23 }
   0xd   : > { %p1994_p8 = pnand %p1764_p6, %p30_p4  ;;  %s1999_s25 = scalar_lea.sflag [#allocation3], %s84_s16 }
   0xe   : > { %s1865_s26 = scalar_lea.hbm %s1990_s21, 1024  ;;  %s1870_s29 = scalar_lea.hbm %s2345_s0, 2048 }
   0xf   : > { %p1866_p10 = scmp.ne.s32.totalorder %s1990_s21, %s1865_s26  ;;  %p1867_p11 = pneg %p1994_p8 }
  0x10   : > { %p1871_p0 = scmp.lt.u32.totalorder %s1990_s21, %s2345_s0  ;;  %p1872_p1 = scmp.lt.u32.totalorder %s1870_s29, %s1865_s26 }
  0x11   : > { %p1868_p12 = pnand %p1867_p11, %p1866_p10  ;;  %p1874_p3 = scmp.lt.u32.totalorder %s1865_s26, %s1990_s21 }
  0x12   : > { %p1873_p2 = por %p1872_p1, %p1871_p0 }
  0x13   : > { %p1869_p13 = pneg %p1868_p12 }
  0x14   : > { %p1875_p4 = por %p1874_p3, %p1873_p2 }
  0x16   : > { %p1876_p5 = pnand %p1875_p4, %p1869_p13 }
  0x18   : > { %1879 = shalt.err (!%p1876_p5)
}
  0x19   : > { %s1880_s3 = scalar_lea.vmem %s1992_s23, 1024  ;;  %s1931_s4 = smov [#allocation2]  }
  0x1a   : > { %p1881_p6 = scmp.ne.s32.totalorder %s1992_s23, %s1880_s3  ;;  %s1885_s5 = sshll.u32 %s1931_s4, 4  ;;  %s1886_s5 = int_to_ptr.vmem [resolvable:$false] %s1885_s5 }
  0x1b   : > { %s1887_s6 = scalar_lea.vmem %s1886_s5, 2048  ;;  %p1888_p9 = scmp.lt.s32.totalorder %s1992_s23, %s1886_s5 }
  0x1c   : > { %p1883_p10 = pnand %p1881_p6, %p1867_p11  ;;  %p1889_p0 = scmp.lt.s32.totalorder %s1887_s6, %s1880_s3 }
  0x1e   : > { %p1884_p12 = pneg %p1883_p10  ;;  %p1890_p1 = por %p1889_p0, %p1888_p9 }
  0x20   : > { %p1891_p2 = pnand %p1890_p1, %p1884_p12 }
  0x22   : > { %1894 = shalt.err (!%p1891_p2)
}
  0x23   : > { %s1932_s12 = smov 64   ;;  %s1933_s13 = smov 4  }
  0x24   : > { %1763 = dma.hbm_to_vmem [thread:$0]  (!%p1994_p8), %s1990_s21, 1024, %s1992_s23, %s1999_s25, %s1932_s12, %s1932_s12, %s1933_s13  }
  0x25   : > { %p103_p11 = scmp.lt.s32.totalorder %s1929_s9, 3  ;;  %p2349_p13 = scmp.ge.s32.totalorder %s1929_s9, 1 }
  0x27   : > { %p104_p3 = pnand %p2349_p13, %p103_p11 }
  0x28   : > { %s109_s16 = sand.u32 (!%p104_p3), 1, %s1921_s7  }
  0x29   : > { %107 = sbr.rel (%p104_p3) target bundleno = 616 (0x268), region = 24  ;;  %s1608_s17 = sshll.u32 (!%p104_p3), %s109_s16, 6 }
  0x2a   : > { %s110_s18 = scalar_lea.sflag (!%p104_p3), [#allocation3], %s109_s16  ;;  %s2031_s19 = scalar_lea.vmem (!%p104_p3), [#allocation2], %s1608_s17 }
  0x30   : > { %1912 = dma.done.wait (%p1981_p7), %s110_s18, 1024  }
  0x31   : > { %1914 = vsyncadd (%p1981_p7), %s110_s18, 4294966272  ;;  %v1934_v0 = vmov 0.0   ;;  %vm1935_vm0 = vmmov 0   ;;  %vm155_vm1 = vcmask 261120   ;;  %v139_v1 = vld [vmem:[%s2031_s19] sm:$0xf] }
  0x32   : > { %1678 = vmatprep.subr.mxu0 %v1934_v0  ;;  %1680 = vmatprep.mubr.msk.f32.mxu0 %vm1935_vm0, %v1934_v0  ;;  %v140_v2 = vld [vmem:[%s2031_s19 + $0x4] sm:$0xf]  ;;  %v141_v3 = vld [vmem:[%s2031_s19 + $0x8] sm:$0xf]  ;;  %v142_v4 = vld [vmem:[%s2031_s19 + $0xc] sm:$0xf] }
  0x33   : > { %1683 = vmatprep.subr.mxu1 %v1934_v0  ;;  %1685 = vmatprep.mubr.msk.f32.mxu1 %vm1935_vm0, %v1934_v0  ;;  %v143_v5 = vld [vmem:[%s2031_s19 + $0x10] sm:$0xf]  ;;  %v144_v6 = vld [vmem:[%s2031_s19 + $0x14] sm:$0xf]  ;;  %v145_v7 = vld [vmem:[%s2031_s19 + $0x18] sm:$0xf] }
  0x34   : > { %1679 = vmatpush3.xpose.msk.msra.mxu0 %vm155_vm1, %v139_v1  ;;  %1684 = vmatpush3.xpose.msk.msra.mxu1 %vm155_vm1, %v140_v2  ;;  %v146_v8 = vld [vmem:[%s2031_s19 + $0x1c] sm:$0xf]  ;;  %v147_v9 = vld [vmem:[%s2031_s19 + $0x20] sm:$0xf]  ;;  %v148_v10 = vld [vmem:[%s2031_s19 + $0x24] sm:$0xf] }
  0x35   : > { %1688 = vmatprep.subr.mxu0 %v1934_v0  ;;  %1693 = vmatprep.subr.mxu1 %v1934_v0  ;;  %v149_v11 = vld [vmem:[%s2031_s19 + $0x28] sm:$0xf]  ;;  %v150_v12 = vld [vmem:[%s2031_s19 + $0x2c] sm:$0xf]  ;;  %v151_v13 = vld [vmem:[%s2031_s19 + $0x30] sm:$0xf] }
  0x36   : > { %v152_v14 = vld [vmem:[%s2031_s19 + $0x34] sm:$0xf]  ;;  %v153_v15 = vld [vmem:[%s2031_s19 + $0x38] sm:$0xf]  ;;  %v154_v16 = vld [vmem:[%s2031_s19 + $0x3c] sm:$0xf] }
  0x37   : > { %1681 = vmatmul.mubr.msk.f32.vlgmr.msra.gmra.mrb[0].mxu0 %vm155_vm1, %v139_v1  ;;  %1686 = vmatmul.mubr.msk.f32.vlgmr.msra.gmra.mrb[0].mxu1 %vm155_vm1, %v140_v2  ;;  %vm1340_vm2 = vcmask 27648   ;;  %s1609_s15 = sshll.u32 %s1600_s10, 4 }
  0x38   : > { %1689 = vmatpush3.xpose.msk.msra.mxu0 %vm155_vm1, %v141_v3  ;;  %1690 = vmatprep.mubr.msk.f32.mxu0 %vm1935_vm0, %v1934_v0  ;;  %p134_p7 = scmp.lt.s32.totalorder %s1609_s15, 31 }
  0x39   : > { %1698 = vmatprep.subr.mxu0 %v1934_v0  ;;  %1694 = vmatpush3.xpose.msk.msra.mxu1 %vm155_vm1, %v142_v4 }
  0x3a   : > { %1695 = vmatprep.mubr.msk.f32.mxu1 %vm1935_vm0, %v1934_v0  ;;  %1703 = vmatprep.subr.mxu1 %v1934_v0  ;;  %s2355_s15 = smov (!%p134_p7, %s1609_s15), 31 }
  0x3b   : > { %1691 = vmatmul.mubr.msk.f32.vlgmr.msra.gmra.mrb[2].mxu0 %vm155_vm1, %v141_v3  ;;  %s1610_s20 = sshll.u32 %s2355_s15, 2 }
  0x3c   : > { %1699 = vmatpush3.xpose.msk.msra.mxu0 %vm155_vm1, %v143_v5  ;;  %1700 = vmatprep.mubr.msk.f32.mxu0 %vm1935_vm0, %v1934_v0  ;;  %s2282_s23 = scalar_lea.vmem %s2346_s1, %s1610_s20 }
  0x3d   : > { %1696 = vmatmul.mubr.msk.f32.vlgmr.msra.gmra.mrb[2].mxu1 %vm155_vm1, %v142_v4  ;;  %1708 = vmatprep.subr.mxu0 %v1934_v0 }
  0x3e   : > { %1704 = vmatpush3.xpose.msk.msra.mxu1 %vm155_vm1, %v144_v6  ;;  %1705 = vmatprep.mubr.msk.f32.mxu1 %vm1935_vm0, %v1934_v0 }
  0x3f   : > { %1701 = vmatmul.mubr.msk.f32.vlgmr.msra.gmra.mrb[4].mxu0 %vm155_vm1, %v143_v5  ;;  %1713 = vmatprep.subr.mxu1 %v1934_v0 }
  0x40   : > { %1709 = vmatpush3.xpose.msk.msra.mxu0 %vm155_vm1, %v145_v7  ;;  %1710 = vmatprep.mubr.msk.f32.mxu0 %vm1935_vm0, %v1934_v0 }
  0x41   : > { %1706 = vmatmul.mubr.msk.f32.vlgmr.msra.gmra.mrb[4].mxu1 %vm155_vm1, %v144_v6  ;;  %1718 = vmatprep.subr.mxu0 %v1934_v0 }
  0x42   : > { %1714 = vmatpush3.xpose.msk.msra.mxu1 %vm155_vm1, %v146_v8  ;;  %1715 = vmatprep.mubr.msk.f32.mxu1 %vm1935_vm0, %v1934_v0 }
  0x43   : > { %1711 = vmatmul.mubr.msk.f32.vlgmr.msra.gmra.mrb[6].mxu0 %vm155_vm1, %v145_v7  ;;  %1723 = vmatprep.subr.mxu1 %v1934_v0 }
  0x44   : > { %1719 = vmatpush3.xpose.msk.msra.mxu0 %vm155_vm1, %v147_v9  ;;  %1720 = vmatprep.mubr.msk.f32.mxu0 %vm1935_vm0, %v1934_v0 }
  0x45   : > { %1716 = vmatmul.mubr.msk.f32.vlgmr.msra.gmra.mrb[6].mxu1 %vm155_vm1, %v146_v8  ;;  %1728 = vmatprep.subr.mxu0 %v1934_v0 }
  0x46   : > { %1724 = vmatpush3.xpose.msk.msra.mxu1 %vm155_vm1, %v148_v10  ;;  %1725 = vmatprep.mubr.msk.f32.mxu1 %vm1935_vm0, %v1934_v0 }
  0x47   : > { %1721 = vmatmul.mubr.msk.f32.vlgmr.msra.gmra.mrb[8].mxu0 %vm155_vm1, %v147_v9  ;;  %1733 = vmatprep.subr.mxu1 %v1934_v0 }
  0x48   : > { %1729 = vmatpush3.xpose.msk.msra.mxu0 %vm155_vm1, %v149_v11  ;;  %1730 = vmatprep.mubr.msk.f32.mxu0 %vm1935_vm0, %v1934_v0 }
  0x49   : > { %1726 = vmatmul.mubr.msk.f32.vlgmr.msra.gmra.mrb[8].mxu1 %vm155_vm1, %v148_v10  ;;  %1738 = vmatprep.subr.mxu0 %v1934_v0 }
  0x4a   : > { %1734 = vmatpush3.xpose.msk.msra.mxu1 %vm155_vm1, %v150_v12  ;;  %1735 = vmatprep.mubr.msk.f32.mxu1 %vm1935_vm0, %v1934_v0 }
  0x4b   : > { %1731 = vmatmul.mubr.msk.f32.vlgmr.msra.gmra.mrb[10].mxu0 %vm155_vm1, %v149_v11  ;;  %1743 = vmatprep.subr.mxu1 %v1934_v0 }
  0x4c   : > { %1739 = vmatpush3.xpose.msk.msra.mxu0 %vm155_vm1, %v151_v13  ;;  %1740 = vmatprep.mubr.msk.f32.mxu0 %vm1935_vm0, %v1934_v0 }
  0x4d   : > { %1736 = vmatmul.mubr.msk.f32.vlgmr.msra.gmra.mrb[10].mxu1 %vm155_vm1, %v150_v12  ;;  %1748 = vmatprep.subr.mxu0 %v1934_v0 }
  0x4e   : > { %1744 = vmatpush3.xpose.msk.msra.mxu1 %vm155_vm1, %v152_v14  ;;  %1745 = vmatprep.mubr.msk.f32.mxu1 %vm1935_vm0, %v1934_v0 }
  0x4f   : > { %1741 = vmatmul.mubr.msk.f32.vlgmr.msra.gmra.mrb[12].mxu0 %vm155_vm1, %v151_v13  ;;  %1753 = vmatprep.subr.mxu1 %v1934_v0 }
  0x50   : > { %1749 = vmatpush3.xpose.msk.msra.mxu0 %vm155_vm1, %v153_v15  ;;  %1750 = vmatprep.mubr.msk.f32.mxu0 %vm1935_vm0, %v1934_v0 }
  0x51   : > { %1746 = vmatmul.mubr.msk.f32.vlgmr.msra.gmra.mrb[12].mxu1 %vm155_vm1, %v152_v14 }
  0x52   : > { %1754 = vmatpush3.xpose.msk.msra.mxu1 %vm155_vm1, %v154_v16  ;;  %1755 = vmatprep.mubr.msk.f32.mxu1 %vm1935_vm0, %v1934_v0 }
  0x53   : > { %1751 = vmatmul.mubr.msk.f32.vlgmr.msra.gmra.mrb[14].mxu0 %vm155_vm1, %v153_v15 }
  0x55   : > { %1756 = vmatmul.mubr.msk.f32.vlgmr.msra.gmra.mrb[14].mxu1 %vm155_vm1, %v154_v16 }
 0x10a   : > { %v225_v17 = vpop.f32.mrb[0].mxu0  ;;  %v298_v18 = vpop.f32.mrb[0].mxu1 }
 0x10b   : > { %v2133_v19 = vmul.f32 0.17677669, %v225_v17  ;;  %v1682_v20 = vpop.f32.mrb[1].mxu0  ;;  %v2135_v21 = vmul.f32 0.17677669, %v298_v18  ;;  %v1687_v22 = vpop.f32.mrb[1].mxu1 }
 0x10d   : > { %v1341_v23 = vsel %vm1340_vm2, %v2133_v19, -inf  ;;  %v1344_v27 = vsel %vm1340_vm2, %v2135_v21, -inf }
 0x10e   : > { %1342 = vmax.xlane.f32.xlu0 %v1341_v23  ;;  %v371_v24 = vpop.f32.mrb[2].mxu0 }
 0x10f   : > { %v2139_v25 = vmul.f32 0.17677669, %v371_v24  ;;  %v1692_v26 = vpop.f32.mrb[3].mxu0 }
 0x110   : > { %v444_v28 = vpop.f32.mrb[2].mxu1 }
 0x111   : > { %v2143_v29 = vmul.f32 0.17677669, %v444_v28  ;;  %v1347_v30 = vsel %vm1340_vm2, %v2139_v25, -inf  ;;  %v1697_v31 = vpop.f32.mrb[3].mxu1 }
 0x112   : > { %1345 = vmax.xlane.f32.xlu0 %v1344_v27  ;;  %1348 = vmax.xlane.f32.xlu1 %v1347_v30  ;;  %v517_v32 = vpop.f32.mrb[4].mxu0 }
 0x113   : > { %v2147_v33 = vmul.f32 0.17677669, %v517_v32  ;;  %v1702_v34 = vpop.f32.mrb[5].mxu0  ;;  %v1350_v35 = vsel %vm1340_vm2, %v2143_v29, -inf }
 0x114   : > { %v590_v36 = vpop.f32.mrb[4].mxu1 }
 0x115   : > { %v2151_v37 = vmul.f32 0.17677669, %v590_v36  ;;  %v1353_v38 = vsel %vm1340_vm2, %v2147_v33, -inf  ;;  %v1707_v39 = vpop.f32.mrb[5].mxu1 }
 0x116   : > { %1351 = vmax.xlane.f32.xlu1 %v1350_v35  ;;  %1354 = vmax.xlane.f32.xlu0 %v1353_v38  ;;  %v663_v40 = vpop.f32.mrb[6].mxu0 }
 0x117   : > { %v2155_v41 = vmul.f32 0.17677669, %v663_v40  ;;  %v1712_v42 = vpop.f32.mrb[7].mxu0  ;;  %v1356_v43 = vsel %vm1340_vm2, %v2151_v37, -inf }
 0x118   : > { %v736_v44 = vpop.f32.mrb[6].mxu1 }
 0x119   : > { %v2159_v45 = vmul.f32 0.17677669, %v736_v44  ;;  %v1359_v46 = vsel %vm1340_vm2, %v2155_v41, -inf  ;;  %v1717_v47 = vpop.f32.mrb[7].mxu1 }
 0x11a   : > { %1357 = vmax.xlane.f32.xlu1 %v1356_v43  ;;  %1360 = vmax.xlane.f32.xlu0 %v1359_v46  ;;  %v809_v48 = vpop.f32.mrb[8].mxu0 }
 0x11b   : > { %v2163_v49 = vmul.f32 0.17677669, %v809_v48  ;;  %v1722_v50 = vpop.f32.mrb[9].mxu0  ;;  %v1362_v51 = vsel %vm1340_vm2, %v2159_v45, -inf }
 0x11c   : > { %v882_v52 = vpop.f32.mrb[8].mxu1 }
 0x11d   : > { %v2167_v53 = vmul.f32 0.17677669, %v882_v52  ;;  %v1365_v54 = vsel %vm1340_vm2, %v2163_v49, -inf  ;;  %v1727_v55 = vpop.f32.mrb[9].mxu1 }
 0x11e   : > { %1363 = vmax.xlane.f32.xlu1 %v1362_v51  ;;  %1366 = vmax.xlane.f32.xlu0 %v1365_v54  ;;  %v955_v56 = vpop.f32.mrb[10].mxu0 }
 0x11f   : > { %v2171_v57 = vmul.f32 0.17677669, %v955_v56  ;;  %v1732_v58 = vpop.f32.mrb[11].mxu0  ;;  %v1368_v59 = vsel %vm1340_vm2, %v2167_v53, -inf }
 0x120   : > { %v1028_v60 = vpop.f32.mrb[10].mxu1 }
 0x121   : > { %v2175_v61 = vmul.f32 0.17677669, %v1028_v60  ;;  %v1371_v62 = vsel %vm1340_vm2, %v2171_v57, -inf  ;;  %v1737_v63 = vpop.f32.mrb[11].mxu1 }
 0x122   : > { %1369 = vmax.xlane.f32.xlu1 %v1368_v59  ;;  %1372 = vmax.xlane.f32.xlu0 %v1371_v62  ;;  %v1101_v0 = vpop.f32.mrb[12].mxu0 }
 0x123   : > { %v2179_v1 = vmul.f32 0.17677669, %v1101_v0  ;;  %v1742_v2 = vpop.f32.mrb[13].mxu0  ;;  %v1374_v3 = vsel %vm1340_vm2, %v2175_v61, -inf }
 0x124   : > { %v1174_v4 = vpop.f32.mrb[12].mxu1 }
 0x125   : > { %v2183_v5 = vmul.f32 0.17677669, %v1174_v4  ;;  %v1377_v6 = vsel %vm1340_vm2, %v2179_v1, -inf  ;;  %v1747_v7 = vpop.f32.mrb[13].mxu1 }
 0x126   : > { %1375 = vmax.xlane.f32.xlu1 %v1374_v3  ;;  %1378 = vmax.xlane.f32.xlu0 %v1377_v6  ;;  %v1247_v8 = vpop.f32.mrb[14].mxu0 }
 0x127   : > { %v2187_v9 = vmul.f32 0.17677669, %v1247_v8  ;;  %v1380_v10 = vsel %vm1340_vm2, %v2183_v5, -inf  ;;  %v1752_v11 = vpop.f32.mrb[15].mxu0 }
 0x128   : > { %v1320_v12 = vpop.f32.mrb[14].mxu1 }
 0x129   : > { %v2191_v13 = vmul.f32 0.17677669, %v1320_v12  ;;  %v1383_v14 = vsel %vm1340_vm2, %v2187_v9, -inf  ;;  %v1757_v15 = vpop.f32.mrb[15].mxu1 }
 0x12a   : > { %1381 = vmax.xlane.f32.xlu1 %v1380_v10  ;;  %1384 = vmax.xlane.f32.xlu0 %v1383_v14 }
 0x12b   : > { %v1386_v16 = vsel %vm1340_vm2, %v2191_v13, -inf }
 0x12e   : > { %1387 = vmax.xlane.f32.xlu1 %v1386_v16 }
 0x19b   : > { %v1343_v17 = vpop.xlane.xlu0 %1342 }
 0x19c   : > { %v1389_v18 = vsub.f32 %v2133_v19, %v1343_v17 }
 0x19e   : > { %v1405_v20 = vmul.f32 1.442695, %v1389_v18 }
 0x19f   : > { %v1346_v22 = vpop.xlane.xlu0 %1345  ;;  %v1349_v23 = vpop.xlane.xlu1 %1348 }
 0x1a0   : > { %1801 = vpow2.f32 %v1405_v20  ;;  %v1390_v24 = vsub.f32 %v2135_v21, %v1346_v22  ;;  %v1391_v26 = vsub.f32 %v2139_v25, %v1349_v23 }
 0x1a2   : > { %v1407_v27 = vmul.f32 1.442695, %v1390_v24  ;;  %v1409_v28 = vmul.f32 1.442695, %v1391_v26 }
 0x1a3   : > { %v1352_v30 = vpop.xlane.xlu1 %1351  ;;  %v1355_v31 = vpop.xlane.xlu0 %1354 }
 0x1a4   : > { %1803 = vpow2.f32 %v1407_v27  ;;  %v1392_v32 = vsub.f32 %v2143_v29, %v1352_v30  ;;  %v1393_v34 = vsub.f32 %v2147_v33, %v1355_v31 }
 0x1a5   : > { %1805 = vpow2.f32 %v1409_v28 }
 0x1a6   : > { %v1411_v35 = vmul.f32 1.442695, %v1392_v32  ;;  %v1413_v19 = vmul.f32 1.442695, %v1393_v34 }
 0x1a7   : > { %v1358_v36 = vpop.xlane.xlu1 %1357  ;;  %v1361_v38 = vpop.xlane.xlu0 %1360 }
 0x1a8   : > { %1807 = vpow2.f32 %v1411_v35  ;;  %v1394_v39 = vsub.f32 %v2151_v37, %v1358_v36  ;;  %v1395_v21 = vsub.f32 %v2155_v41, %v1361_v38 }
 0x1a9   : > { %1809 = vpow2.f32 %v1413_v19 }
 0x1aa   : > { %v2204_v25 = vpop.eup %1801  ;;  %v1415_v40 = vmul.f32 1.442695, %v1394_v39  ;;  %v1417_v42 = vmul.f32 1.442695, %v1395_v21 }
 0x1ab   : > { %v1364_v43 = vpop.xlane.xlu1 %1363  ;;  %v1367_v44 = vpop.xlane.xlu0 %1366  ;;  %v1437_v29 = vsel %vm1340_vm2, %v2204_v25, 0.0 }
 0x1ac   : > { %1811 = vpow2.f32 %v1415_v40  ;;  %v1396_v33 = vsub.f32 %v2159_v45, %v1364_v43  ;;  %v1397_v46 = vsub.f32 %v2163_v49, %v1367_v44  ;;  %1438 = vadd.xlane.f32.xlu0 %v1437_v29 }
 0x1ad   : > { %1813 = vpow2.f32 %v1417_v42 }
 0x1ae   : > { %v2210_v37 = vpop.eup %1803  ;;  %v1419_v41 = vmul.f32 1.442695, %v1396_v33  ;;  %v1421_v47 = vmul.f32 1.442695, %v1397_v46 }
 0x1af   : > { %v2212_v48 = vpop.eup %1805  ;;  %v1370_v50 = vpop.xlane.xlu1 %1369  ;;  %v1440_v52 = vsel %vm1340_vm2, %v2210_v37, 0.0 }
 0x1b0   : > { %v1373_v51 = vpop.xlane.xlu0 %1372  ;;  %1815 = vpow2.f32 %v1419_v41  ;;  %v1398_v54 = vsub.f32 %v2167_v53, %v1370_v50  ;;  %1441 = vadd.xlane.f32.xlu1 %v1440_v52  ;;  %v1443_v49 = vsel %vm1340_vm2, %v2212_v48, 0.0 }
 0x1b1   : > { %v1399_v45 = vsub.f32 %v2171_v57, %v1373_v51  ;;  %1817 = vpow2.f32 %v1421_v47  ;;  %1444 = vadd.xlane.f32.xlu0 %v1443_v49 }
 0x1b2   : > { %v2220_v55 = vpop.eup %1807  ;;  %v1423_v56 = vmul.f32 1.442695, %v1398_v54 }
 0x1b3   : > { %v1425_v58 = vmul.f32 1.442695, %v1399_v45  ;;  %v2222_v59 = vpop.eup %1809  ;;  %v1376_v60 = vpop.xlane.xlu1 %1375  ;;  %v1446_v63 = vsel %vm1340_vm2, %v2220_v55, 0.0 }
 0x1b4   : > { %v1379_v62 = vpop.xlane.xlu0 %1378  ;;  %1819 = vpow2.f32 %v1423_v56  ;;  %v1400_v53 = vsub.f32 %v2175_v61, %v1376_v60  ;;  %1447 = vadd.xlane.f32.xlu1 %v1446_v63  ;;  %v1449_v0 = vsel %vm1340_vm2, %v2222_v59, 0.0 }
 0x1b5   : > { %v1401_v57 = vsub.f32 %v2179_v1, %v1379_v62  ;;  %1821 = vpow2.f32 %v1425_v58  ;;  %1450 = vadd.xlane.f32.xlu0 %v1449_v0 }
 0x1b6   : > { %v2230_v2 = vpop.eup %1811  ;;  %v1427_v3 = vmul.f32 1.442695, %v1400_v53 }
 0x1b7   : > { %v1429_v4 = vmul.f32 1.442695, %v1401_v57  ;;  %v2232_v6 = vpop.eup %1813  ;;  %v1382_v7 = vpop.xlane.xlu1 %1381  ;;  %v1452_v10 = vsel %vm1340_vm2, %v2230_v2, 0.0 }
 0x1b8   : > { %v1385_v8 = vpop.xlane.xlu0 %1384  ;;  %1823 = vpow2.f32 %v1427_v3  ;;  %v1402_v61 = vsub.f32 %v2183_v5, %v1382_v7  ;;  %1453 = vadd.xlane.f32.xlu1 %v1452_v10  ;;  %v1455_v11 = vsel %vm1340_vm2, %v2232_v6, 0.0 }
 0x1b9   : > { %v1403_v1 = vsub.f32 %v2187_v9, %v1385_v8  ;;  %1825 = vpow2.f32 %v1429_v4  ;;  %1456 = vadd.xlane.f32.xlu0 %v1455_v11 }
 0x1ba   : > { %v2240_v12 = vpop.eup %1815  ;;  %v1431_v14 = vmul.f32 1.442695, %v1402_v61 }
 0x1bb   : > { %v1433_v15 = vmul.f32 1.442695, %v1403_v1  ;;  %v2242_v16 = vpop.eup %1817  ;;  %v1388_v17 = vpop.xlane.xlu1 %1387  ;;  %v1458_v18 = vsel %vm1340_vm2, %v2240_v12, 0.0 }
 0x1bc   : > { %1827 = vpow2.f32 %v1431_v14  ;;  %v1404_v5 = vsub.f32 %v2191_v13, %v1388_v17  ;;  %1459 = vadd.xlane.f32.xlu1 %v1458_v18  ;;  %v1461_v9 = vsel %vm1340_vm2, %v2242_v16, 0.0 }
 0x1bd   : > { %1829 = vpow2.f32 %v1433_v15  ;;  %1462 = vadd.xlane.f32.xlu0 %v1461_v9 }
 0x1be   : > { %v2249_v20 = vpop.eup %1819  ;;  %v1435_v22 = vmul.f32 1.442695, %v1404_v5 }
 0x1bf   : > { %v2251_v23 = vpop.eup %1821  ;;  %v1464_v24 = vsel %vm1340_vm2, %v2249_v20, 0.0 }
 0x1c0   : > { %1831 = vpow2.f32 %v1435_v22  ;;  %1465 = vadd.xlane.f32.xlu1 %v1464_v24  ;;  %v1467_v26 = vsel %vm1340_vm2, %v2251_v23, 0.0 }
 0x1c1   : > { %1468 = vadd.xlane.f32.xlu0 %v1467_v26 }
 0x1c2   : > { %v2257_v13 = vpop.eup %1823 }
 0x1c3   : > { %v2259_v27 = vpop.eup %1825  ;;  %v1470_v28 = vsel %vm1340_vm2, %v2257_v13, 0.0 }
 0x1c4   : > { %1471 = vadd.xlane.f32.xlu1 %v1470_v28  ;;  %v1473_v30 = vsel %vm1340_vm2, %v2259_v27, 0.0 }
 0x1c5   : > { %1474 = vadd.xlane.f32.xlu0 %v1473_v30 }
 0x1c6   : > { %v2265_v31 = vpop.eup %1827 }
 0x1c7   : > { %v2267_v32 = vpop.eup %1829  ;;  %v1476_v34 = vsel %vm1340_vm2, %v2265_v31, 0.0 }
 0x1c8   : > { %1477 = vadd.xlane.f32.xlu1 %v1476_v34  ;;  %v1479_v35 = vsel %vm1340_vm2, %v2267_v32, 0.0 }
 0x1c9   : > { %1480 = vadd.xlane.f32.xlu0 %v1479_v35 }
 0x1ca   : > { %v2273_v19 = vpop.eup %1831 }
 0x1cb   : > { %v1482_v36 = vsel %vm1340_vm2, %v2273_v19, 0.0 }
 0x1cc   : > { %1483 = vadd.xlane.f32.xlu1 %v1482_v36 }
 0x239   : > { %v1439_v38 = vpop.xlane.xlu0 %1438 }
 0x23a   : > { %1833 = vrcp.f32 %v1439_v38 }
 0x23d   : > { %v1442_v39 = vpop.xlane.xlu1 %1441 }
 0x23e   : > { %1835 = vrcp.f32 %v1442_v39  ;;  %v1445_v21 = vpop.xlane.xlu0 %1444 }
 0x23f   : > { %1837 = vrcp.f32 %v1445_v21 }
 0x241   : > { %v1448_v40 = vpop.xlane.xlu1 %1447 }
 0x242   : > { %1839 = vrcp.f32 %v1448_v40  ;;  %v1451_v42 = vpop.xlane.xlu0 %1450 }
 0x243   : > { %1841 = vrcp.f32 %v1451_v42 }
 0x244   : > { %v1834_v43 = vpop.eup %1833 }
 0x245   : > { %v1501_v44 = vmul.f32 %v1834_v43, %v2204_v25  ;;  %v1454_v29 = vpop.xlane.xlu1 %1453 }
 0x246   : > { %1843 = vrcp.f32 %v1454_v29  ;;  %v1457_v33 = vpop.xlane.xlu0 %1456 }
 0x247   : > { %1517 = vst.msk [vmem:[%s2282_s23] sm:$0xf] %vm1340_vm2, %v1501_v44  ;;  %1845 = vrcp.f32 %v1457_v33 }
 0x248   : > { %v1836_v46 = vpop.eup %1835 }
 0x249   : > { %v1838_v41 = vpop.eup %1837  ;;  %v1502_v47 = vmul.f32 %v1836_v46, %v2210_v37  ;;  %v1460_v50 = vpop.xlane.xlu1 %1459 }
 0x24a   : > { %v1503_v51 = vmul.f32 %v1838_v41, %v2212_v48  ;;  %1847 = vrcp.f32 %v1460_v50  ;;  %v1463_v52 = vpop.xlane.xlu0 %1462 }
 0x24b   : > { %1518 = vst.msk [vmem:[%s2282_s23 + $0x4] sm:$0xf] %vm1340_vm2, %v1502_v47  ;;  %1849 = vrcp.f32 %v1463_v52 }
 0x24c   : > { %v1840_v25 = vpop.eup %1839  ;;  %1519 = vst.msk [vmem:[%s2282_s23 + $0x8] sm:$0xf] %vm1340_vm2, %v1503_v51 }
 0x24d   : > { %v1842_v54 = vpop.eup %1841  ;;  %v1504_v45 = vmul.f32 %v1840_v25, %v2220_v55  ;;  %v1466_v49 = vpop.xlane.xlu1 %1465 }
 0x24e   : > { %v1505_v56 = vmul.f32 %v1842_v54, %v2222_v59  ;;  %1851 = vrcp.f32 %v1466_v49  ;;  %v1469_v37 = vpop.xlane.xlu0 %1468 }
 0x24f   : > { %1520 = vst.msk [vmem:[%s2282_s23 + $0xc] sm:$0xf] %vm1340_vm2, %v1504_v45  ;;  %1853 = vrcp.f32 %v1469_v37 }
 0x250   : > { %v1844_v48 = vpop.eup %1843  ;;  %1521 = vst.msk [vmem:[%s2282_s23 + $0x10] sm:$0xf] %vm1340_vm2, %v1505_v56 }
 0x251   : > { %v1846_v58 = vpop.eup %1845  ;;  %v1506_v60 = vmul.f32 %v1844_v48, %v2230_v2  ;;  %v1472_v62 = vpop.xlane.xlu1 %1471 }
 0x252   : > { %v1507_v63 = vmul.f32 %v1846_v58, %v2232_v6  ;;  %1855 = vrcp.f32 %v1472_v62  ;;  %v1475_v55 = vpop.xlane.xlu0 %1474 }
 0x253   : > { %1522 = vst.msk [vmem:[%s2282_s23 + $0x14] sm:$0xf] %vm1340_vm2, %v1506_v60  ;;  %1857 = vrcp.f32 %v1475_v55 }
 0x254   : > { %v1848_v59 = vpop.eup %1847  ;;  %1523 = vst.msk [vmem:[%s2282_s23 + $0x18] sm:$0xf] %vm1340_vm2, %v1507_v63 }
 0x255   : > { %v1850_v53 = vpop.eup %1849  ;;  %v1508_v57 = vmul.f32 %v1848_v59, %v2240_v12  ;;  %v1478_v0 = vpop.xlane.xlu1 %1477 }
 0x256   : > { %v1509_v2 = vmul.f32 %v1850_v53, %v2242_v16  ;;  %1859 = vrcp.f32 %v1478_v0  ;;  %v1481_v3 = vpop.xlane.xlu0 %1480 }
 0x257   : > { %1524 = vst.msk [vmem:[%s2282_s23 + $0x1c] sm:$0xf] %vm1340_vm2, %v1508_v57  ;;  %1861 = vrcp.f32 %v1481_v3 }
 0x258   : > { %v1852_v4 = vpop.eup %1851  ;;  %1525 = vst.msk [vmem:[%s2282_s23 + $0x20] sm:$0xf] %vm1340_vm2, %v1509_v2 }
 0x259   : > { %v1854_v6 = vpop.eup %1853  ;;  %v1510_v7 = vmul.f32 %v1852_v4, %v2249_v20  ;;  %v1484_v8 = vpop.xlane.xlu1 %1483 }
 0x25a   : > { %v1511_v10 = vmul.f32 %v1854_v6, %v2251_v23  ;;  %1863 = vrcp.f32 %v1484_v8 }
 0x25b   : > { %1526 = vst.msk [vmem:[%s2282_s23 + $0x24] sm:$0xf] %vm1340_vm2, %v1510_v7 }
 0x25c   : > { %v1856_v61 = vpop.eup %1855  ;;  %1527 = vst.msk [vmem:[%s2282_s23 + $0x28] sm:$0xf] %vm1340_vm2, %v1511_v10 }
 0x25d   : > { %v1858_v1 = vpop.eup %1857  ;;  %v1512_v11 = vmul.f32 %v1856_v61, %v2257_v13 }
 0x25e   : > { %v1513_v12 = vmul.f32 %v1858_v1, %v2259_v27 }
 0x25f   : > { %1528 = vst.msk [vmem:[%s2282_s23 + $0x2c] sm:$0xf] %vm1340_vm2, %v1512_v11 }
 0x260   : > { %v1860_v14 = vpop.eup %1859  ;;  %1529 = vst.msk [vmem:[%s2282_s23 + $0x30] sm:$0xf] %vm1340_vm2, %v1513_v12 }
 0x261   : > { %v1862_v15 = vpop.eup %1861  ;;  %v1514_v16 = vmul.f32 %v1860_v14, %v2265_v31 }
 0x262   : > { %v1515_v17 = vmul.f32 %v1862_v15, %v2267_v32 }
 0x263   : > { %1530 = vst.msk [vmem:[%s2282_s23 + $0x34] sm:$0xf] %vm1340_vm2, %v1514_v16 }
 0x264   : > { %v1864_v18 = vpop.eup %1863  ;;  %1531 = vst.msk [vmem:[%s2282_s23 + $0x38] sm:$0xf] %vm1340_vm2, %v1515_v17 }
 0x265   : > { %v1516_v5 = vmul.f32 %v1864_v18, %v2273_v19 }
 0x267   : > { %1532 = vst.msk [vmem:[%s2282_s23 + $0x3c] sm:$0xf] %vm1340_vm2, %v1516_v5 }
 0x268 PF: > { %p11_p8 = scmp.ge.s32.totalorder %s1966_s11, 4   ;;  %s2350_s6 = smov %s1921_s7 }
 0x269   : > { %s2351_s7 = smov %s1925_s8  ;;  %s2352_s8 = smov %s1976_s14 }
 0x26a   : > { %s2353_s9 = smov %s1966_s11  ;;  %13 = sbr.rel (!%p11_p8) target bundleno = 3 (0x3), region = 64 }
 0x271   :  { %1555 = vsyncpa [#allocation3], 1 }
 0x272   :  { %1557 = vsyncpa [#allocation3 + $0x1], 1 }

</bundles_post_ra>
